<compile_context>
chip_gen: v5e
topology: v5e:2x2
jax: 0.10.0
libtpu: 0.0.40
codegen_flags: <defaults>
</compile_context>

<pallas_src>
import jax
import jax.numpy as jnp
from jax.experimental import pallas as pl
from jax.experimental.pallas import tpu as pltpu


def _round_up(a, b):
    return ((a + b - 1) // b) * b


def _classifier_kernel(len_ref, scale_ref, x_ref, w_ref, b_ref, o_ref,
                       acc_ref, coef_ref):
    """One grid step: reduce a (block_b, T, H) slab over time, then one small matmul.

    len_ref, scale_ref : SMEM (B_pad,)  scalar-prefetched lengths / 1/(len*temp)
    x_ref              : VMEM (block_b, T, H)  activations (native dtype)
    w_ref              : VMEM (H, C)           fc weight (already transposed)
    b_ref              : VMEM (1, C)           fc bias
    o_ref              : VMEM (block_b, C)     output block
    acc_ref            : VMEM (block_b, H) f32 scratch: per-row reduced vector * scale
    coef_ref           : VMEM (block_b, 1) f32 scratch: per-row (sum_t m_t) * scale
    """
    i = pl.program_id(0)
    block_b, t, _h = x_ref.shape

    def body(bi, carry):
        gidx = i * block_b + bi
        length = len_ref[gidx]                                    # int32 scalar (SMEM)
        scale = scale_ref[gidx]                                   # f32   scalar (SMEM)

        xr = x_ref[bi].astype(jnp.float32)                        # (T, H)
        tids = jax.lax.broadcasted_iota(jnp.int32, xr.shape, 0)   # time index per row
        m = (tids < length).astype(jnp.float32)                   # padding mask (VPU)
        xm = xr * m

        sumsq = jnp.sum(xm * xm, axis=0, keepdims=True)           # (1, H)
        ssum = jnp.sum(xm, axis=0, keepdims=True)                 # (1, H)
        # rsqrt(max(sumsq, eps^2)) == 1 / clamp_min(norm, 1e-12): F.normalize semantics.
        inv = jax.lax.rsqrt(jnp.maximum(sumsq, 1e-24))            # EUP slot

        acc_ref[pl.ds(bi, 1), :] = ssum * inv * scale             # (1, H)
        msum = jnp.minimum(length, t).astype(jnp.float32)         # sum_t m_t
        coef_ref[pl.ds(bi, 1), :] = (msum * scale) * jnp.ones((1, 1), jnp.float32)
        return carry

    jax.lax.fori_loop(0, block_b, body, 0)

    # y = (sum_t m*z) @ W * 1/(len*temp)  +  b * (sum_t m) * 1/(len*temp)
    o_ref[...] = (
        jnp.dot(acc_ref[...], w_ref[...], preferred_element_type=jnp.float32)
        + coef_ref[...] * b_ref[...]
    ).astype(o_ref.dtype)


def _choose_block_b(B, T, H, itemsize, target_block_bytes):
    """Pick a batch-chunk size by layout-padded bytes (lanes pad to 128, sublanes
    to 8/16/32 depending on dtype), keep >=2 grid steps for v7x megacore only when
    the whole batch would otherwise fit in one block, and sublane-align the block."""
    sub = {4: 8, 2: 16, 1: 32}.get(itemsize, 8)
    row_bytes = _round_up(T, sub) * _round_up(H, 128) * itemsize
    bb = max(1, target_block_bytes // row_bytes)
    if bb >= B and B > 16:
        bb = -(-B // 2)          # split so both v7x TensorCores get a step
    bb = min(bb, max(B, 1))
    return _round_up(max(bb, 1), 8)   # align the (block_b, C)/(block_b, H) blocks


def classifier_forward(x, lengths, mask_1, weight, bias, temp, *,
                       block_b=None, target_block_bytes=4 * 1024 * 1024):
    """x: (B, T, H), lengths: (B,) int, mask_1: (B, T, H) padding mask (unused by the
    kernel — regenerated from `lengths`, see NOTE at top), weight: (C, H) PyTorch
    Linear layout, bias: (C,), temp: python float scalar.  Returns (B, C) f32."""
    del mask_1  # kernel rebuilds the binary time mask from `lengths` (MME pipeline)

    B, T, H = x.shape
    C = weight.shape[0]
    itemsize = jnp.dtype(x.dtype).itemsize

    if block_b is None:
        block_b = _choose_block_b(B, T, H, itemsize, target_block_bytes)
    B_pad = _round_up(B, block_b)

    lengths_i = jnp.asarray(lengths, jnp.int32).reshape(B)
    scale = 1.0 / (lengths_i.astype(jnp.float32) * jnp.float32(temp))   # (B,)

    if B_pad != B:
        x = jnp.pad(x, ((0, B_pad - B), (0, 0), (0, 0)))
        lengths_i = jnp.pad(lengths_i, (0, B_pad - B), constant_values=1)
        scale = jnp.pad(scale, (0, B_pad - B))

    w = jnp.asarray(weight, jnp.float32).T            # (H, C)
    b2 = jnp.asarray(bias, jnp.float32).reshape(1, C)

    grid = (B_pad // block_b,)

    # Layout-aware VMEM estimate -> scoped limit (safe on v5e/v6e/v7x).
    sub = {4: 8, 2: 16, 1: 32}.get(itemsize, 8)
    t_pad, h_pad, c_pad = _round_up(T, sub), _round_up(H, 128), _round_up(C, 128)
    x_block_bytes = block_b * t_pad * h_pad * itemsize
    est = (2 * x_block_bytes                               # double-buffered x stream
           + 2 * h_pad * c_pad * 4 + 2 * 8 * c_pad * 4     # resident weight / bias
           + 2 * block_b * c_pad * 4                       # output blocks
           + block_b * h_pad * 4 + block_b * 128 * 4       # acc / coef scratch
           + 6 * t_pad * h_pad * 4)                        # per-row intermediates
    vmem_limit = int(min(max(est + (2 << 20), 16 << 20), 64 << 20))

    out = pl.pallas_call(
        _classifier_kernel,
        out_shape=jax.ShapeDtypeStruct((B_pad, C), jnp.float32),
        grid_spec=pltpu.PrefetchScalarGridSpec(
            num_scalar_prefetch=2,
            grid=grid,
            in_specs=[
                pl.BlockSpec((block_b, T, H), lambda i, lens, scl: (i, 0, 0)),  # x
                pl.BlockSpec((H, C), lambda i, lens, scl: (0, 0)),              # weight
                pl.BlockSpec((1, C), lambda i, lens, scl: (0, 0)),              # bias
            ],
            out_specs=pl.BlockSpec((block_b, C), lambda i, lens, scl: (i, 0)),
            scratch_shapes=[
                pltpu.VMEM((block_b, H), jnp.float32),   # acc
                pltpu.VMEM((block_b, 1), jnp.float32),   # coef
            ],
        ),
        compiler_params=pltpu.CompilerParams(
            dimension_semantics=("parallel",),
            vmem_limit_bytes=vmem_limit,
        ),
    )(lengths_i, scale, x, w, b2)

    return out[:B]


def classifier_forward_ref(x, lengths, mask_1, weight, bias, temp):
    """Pure-JAX reference mirroring the PyTorch module (general (B, T, H) mask)."""
    xm = x * mask_1
    nrm = jnp.sqrt(jnp.sum(xm * xm, axis=1, keepdims=True))
    xn = xm / jnp.maximum(nrm, 1e-12)
    z = xn * mask_1
    out = jnp.einsum("bth,ch->btc", z, weight,
                     precision=jax.lax.Precision.HIGHEST) + bias[None, None, :]
    C = weight.shape[0]
    mask2 = mask_1[:, :, :C]
    y = jnp.sum(out * mask2, axis=1) / lengths.astype(jnp.float32)[:, None]
    return y / temp


if __name__ == "__main__":
    B, T, H, C = 8, 8, 32, 4
    temp = 0.05

    key = jax.random.PRNGKey(0)
    kx, kw, kb, kl = jax.random.split(key, 4)

    x = jax.random.normal(kx, (B, T, H), dtype=jnp.float32)

    # Variable-length sequences -> binary padding mask broadcast over the hidden dim.
    lengths = jax.random.randint(kl, (B,), 1, T + 1).astype(jnp.int32)   # (B,), >= 1
    time_idx = jnp.arange(T)[None, :]                                     # (1, T)
    mask_1 = (time_idx < lengths[:, None]).astype(jnp.float32)            # (B, T)
    mask_1 = jnp.broadcast_to(mask_1[:, :, None], (B, T, H))              # (B, T, H)

    # Deterministic Linear(H, C) parameters (PyTorch layout: weight (C, H), bias (C,)).
    bound = 1.0 / jnp.sqrt(jnp.float32(H))
    weight = jax.random.uniform(kw, (C, H), jnp.float32, -bound, bound)
    bias = jax.random.uniform(kb, (C,), jnp.float32, -bound, bound)

    y_kernel = classifier_forward(x, lengths, mask_1, weight, bias, temp)
    y_kernel = jax.block_until_ready(y_kernel)

    y_ref = classifier_forward_ref(x, lengths, mask_1, weight, bias, temp)
    assert y_kernel.shape == (B, C), y_kernel.shape
    assert jnp.allclose(y_kernel, y_ref, atol=1e-3, rtol=1e-4), (y_kernel, y_ref)

    print("KERNEL_OK")
</pallas_src>

<mosaic_0001>
module attributes {stable_mosaic.version = 11 : i64} {
  func.func @_classifier_kernel(%arg0: i32, %arg1: memref<8xi32, #tpu.memory_space<smem>>, %arg2: memref<8xf32, #tpu.memory_space<smem>>, %arg3: memref<8x8x32xf32, #tpu.memory_space<vmem>>, %arg4: memref<32x4xf32, #tpu.memory_space<vmem>>, %arg5: memref<1x4xf32, #tpu.memory_space<vmem>>, %arg6: memref<8x4xf32, #tpu.memory_space<vmem>>, %arg7: memref<8x32xf32, #tpu.memory_space<vmem>>, %arg8: memref<8x1xf32, #tpu.memory_space<vmem>>) attributes {dimension_semantics = [#tpu.dimension_semantics<parallel>], iteration_bounds = array<i64: 1>, scalar_prefetch = 2 : i64, scratch_operands = 2 : i64, tpu.core_type = #tpu.core_type<tc>, window_params = [{transform_indices = @transform_0, window_bounds = array<i64: 8, 8, 32>}, {pipeline_mode = #tpu.pipeline_mode<synchronous>, transform_indices = @transform_1, window_bounds = array<i64: 32, 4>}, {pipeline_mode = #tpu.pipeline_mode<synchronous>, transform_indices = @transform_2, window_bounds = array<i64: 1, 4>}, {transform_indices = @transform_3, window_bounds = array<i64: 8, 4>}]} {
    %c0_i32 = arith.constant 0 : i32
    %c8_i32 = arith.constant 8 : i32
    %0 = arith.addi %c0_i32, %c8_i32 : i32
    %c1_i32 = arith.constant 1 : i32
    scf.for %arg9 = %c0_i32 to %0 step %c1_i32  : i32 {
      %c8_i32_10 = arith.constant 8 : i32
      %11 = arith.muli %arg0, %c8_i32_10 : i32
      %12 = arith.addi %11, %arg9 : i32
      %13 = arith.index_cast %12 : i32 to index
      %14 = memref.load %arg1[%13] : memref<8xi32, #tpu.memory_space<smem>>
      %15 = arith.index_cast %12 : i32 to index
      %16 = memref.load %arg2[%15] : memref<8xf32, #tpu.memory_space<smem>>
      %17 = arith.index_cast %arg9 : i32 to index
      %c0_11 = arith.constant 0 : index
      %c0_12 = arith.constant 0 : index
      %18 = vector.load %arg3[%17, %c0_11, %c0_12] : memref<8x8x32xf32, #tpu.memory_space<vmem>>, vector<1x8x32xf32>
      %19 = vector.shape_cast %18 : vector<1x8x32xf32> to vector<8x32xf32>
      %20 = tpu.iota {dimensions = array<i32: 0>} : vector<8x32xi32>
      %21 = vector.broadcast %14 : i32 to vector<8x32xi32>
      %22 = arith.cmpi slt, %20, %21 : vector<8x32xi32>
      %23 = arith.extui %22 : vector<8x32xi1> to vector<8x32xi32>
      %24 = arith.sitofp %23 : vector<8x32xi32> to vector<8x32xf32>
      %25 = arith.mulf %19, %24 : vector<8x32xf32>
      %26 = arith.mulf %25, %25 : vector<8x32xf32>
      %cst_13 = arith.constant dense<0.000000e+00> : vector<32xf32>
      %27 = vector.multi_reduction <add>, %26, %cst_13 [0] : vector<8x32xf32> to vector<32xf32>
      %28 = vector.shape_cast %27 : vector<32xf32> to vector<1x32xf32>
      %cst_14 = arith.constant dense<0.000000e+00> : vector<32xf32>
      %29 = vector.multi_reduction <add>, %25, %cst_14 [0] : vector<8x32xf32> to vector<32xf32>
      %30 = vector.shape_cast %29 : vector<32xf32> to vector<1x32xf32>
      %cst_15 = arith.constant 1.000000e-24 : f32
      %31 = vector.broadcast %cst_15 : f32 to vector<1x32xf32>
      %32 = arith.maximumf %28, %31 : vector<1x32xf32>
      %33 = math.rsqrt %32 : vector<1x32xf32>
      %34 = arith.mulf %30, %33 : vector<1x32xf32>
      %35 = vector.broadcast %16 : f32 to vector<1x32xf32>
      %36 = arith.mulf %34, %35 : vector<1x32xf32>
      %37 = arith.index_cast %arg9 : i32 to index
      %c0_16 = arith.constant 0 : index
      %38 = vector.load %arg7[%37, %c0_16] : memref<8x32xf32, #tpu.memory_space<vmem>>, vector<1x32xf32>
      tpu.vector_store %arg7[%37, %c0_16], %36 {strides = array<i32>} : memref<8x32xf32, #tpu.memory_space<vmem>>, vector<1x32xf32>,
      %c8_i32_17 = arith.constant 8 : i32
      %39 = arith.minsi %14, %c8_i32_17 : i32
      %40 = arith.sitofp %39 : i32 to f32
      %41 = arith.mulf %40, %16 : f32
      %cst_18 = arith.constant 1.000000e+00 : f32
      %42 = vector.broadcast %cst_18 : f32 to vector<1x1xf32>
      %43 = vector.broadcast %41 : f32 to vector<1x1xf32>
      %44 = arith.mulf %43, %42 : vector<1x1xf32>
      %45 = arith.index_cast %arg9 : i32 to index
      %c0_19 = arith.constant 0 : index
      %46 = vector.load %arg8[%45, %c0_19] : memref<8x1xf32, #tpu.memory_space<vmem>>, vector<1x1xf32>
      tpu.vector_store %arg8[%45, %c0_19], %44 {strides = array<i32>} : memref<8x1xf32, #tpu.memory_space<vmem>>, vector<1x1xf32>,
    }
    %c8_i32_0 = arith.constant 8 : i32
    %c0 = arith.constant 0 : index
    %c0_1 = arith.constant 0 : index
    %1 = vector.load %arg7[%c0, %c0_1] : memref<8x32xf32, #tpu.memory_space<vmem>>, vector<8x32xf32>
    %c0_2 = arith.constant 0 : index
    %c0_3 = arith.constant 0 : index
    %2 = vector.load %arg4[%c0_2, %c0_3] : memref<32x4xf32, #tpu.memory_space<vmem>>, vector<32x4xf32>
    %cst = arith.constant dense<0.000000e+00> : vector<8x4xf32>
    %3 = tpu.matmul %1, %2, %cst {dimension_numbers = #tpu.dot_dimension_numbers<[1], [0], [0], [1], [0, 0, 1, 1], [], []>} : vector<8x32xf32>, vector<32x4xf32>, vector<8x4xf32> -> vector<8x4xf32>
    %c0_4 = arith.constant 0 : index
    %c0_5 = arith.constant 0 : index
    %4 = vector.load %arg8[%c0_4, %c0_5] : memref<8x1xf32, #tpu.memory_space<vmem>>, vector<8x1xf32>
    %c0_6 = arith.constant 0 : index
    %c0_7 = arith.constant 0 : index
    %5 = vector.load %arg5[%c0_6, %c0_7] : memref<1x4xf32, #tpu.memory_space<vmem>>, vector<1x4xf32>
    %6 = vector.broadcast %4 : vector<8x1xf32> to vector<8x4xf32>
    %7 = vector.broadcast %5 : vector<1x4xf32> to vector<8x4xf32>
    %8 = arith.mulf %6, %7 : vector<8x4xf32>
    %9 = arith.addf %3, %8 : vector<8x4xf32>
    %c0_8 = arith.constant 0 : index
    %c0_9 = arith.constant 0 : index
    %10 = vector.load %arg6[%c0_8, %c0_9] : memref<8x4xf32, #tpu.memory_space<vmem>>, vector<8x4xf32>
    tpu.vector_store %arg6[%c0_8, %c0_9], %9 {strides = array<i32>} : memref<8x4xf32, #tpu.memory_space<vmem>>, vector<8x4xf32>,
    return
  }
  func.func @transform_0(%arg0: i32, %arg1: memref<8xi32, #tpu.memory_space<smem>>, %arg2: memref<8xf32, #tpu.memory_space<smem>>) -> (i32, i32, i32) {
    %c0_i32 = arith.constant 0 : i32
    %c0_i32_0 = arith.constant 0 : i32
    %c0_i32_1 = arith.constant 0 : i32
    return %arg0, %c0_i32, %c0_i32_0 : i32, i32, i32
  }
  func.func @transform_1(%arg0: i32, %arg1: memref<8xi32, #tpu.memory_space<smem>>, %arg2: memref<8xf32, #tpu.memory_space<smem>>) -> (i32, i32) {
    %c0_i32 = arith.constant 0 : i32
    %c0_i32_0 = arith.constant 0 : i32
    %c0_i32_1 = arith.constant 0 : i32
    return %c0_i32, %c0_i32_0 : i32, i32
  }
  func.func @transform_2(%arg0: i32, %arg1: memref<8xi32, #tpu.memory_space<smem>>, %arg2: memref<8xf32, #tpu.memory_space<smem>>) -> (i32, i32) {
    %c0_i32 = arith.constant 0 : i32
    %c0_i32_0 = arith.constant 0 : i32
    %c0_i32_1 = arith.constant 0 : i32
    return %c0_i32, %c0_i32_0 : i32, i32
  }
  func.func @transform_3(%arg0: i32, %arg1: memref<8xi32, #tpu.memory_space<smem>>, %arg2: memref<8xf32, #tpu.memory_space<smem>>) -> (i32, i32) {
    %c0_i32 = arith.constant 0 : i32
    %c0_i32_0 = arith.constant 0 : i32
    return %arg0, %c0_i32 : i32, i32
  }
}

</mosaic_0001>

<bundles_post_ra>
// kernel: tpu_custom_call.1
= control target key start
LH: loop header
LB: loop body
LE: loop exit
PB: predicated region body
PF: predicated region fallthrough
CT: control target
= control target key end

     0   :  { %s244_s24 = smov [#allocation5]   ;;  %s245_s25 = smov [#allocation6]   ;;  %s328_s0 = inlined_call_operand.vmem [shape: s32[8], index: 0, kind: input, shape index: {}]   ;;  %s329_s2 = inlined_call_operand.hbm [shape: f32[8,8,32], index: 2, kind: input, shape index: {}]   ;;  %s330_s3 = inlined_call_operand.vmem [shape: f32[32,4], index: 3, kind: input, shape index: {}]   ;;  %s331_s4 = inlined_call_operand.vmem [shape: f32[1,4], index: 4, kind: input, shape index: {}]   ;;  %s332_s5 = inlined_call_operand.vmem [shape: f32[8,4], index: 5, kind: output, shape index: {}]   ;;  %s333_s1 = inlined_call_operand.vmem [shape: f32[8], index: 1, kind: input, shape index: {}]  }
   0x1   :  { %s11_s20 = sshll.u32 %s328_s0, 4  ;;  %s16_s23 = sshll.u32 %s333_s1, 4  ;;  %s12_s20 = int_to_ptr.vmem [resolvable:$true] %s11_s20  ;;  %s17_s23 = int_to_ptr.vmem [resolvable:$true] %s16_s23 }
   0x2   :  { %14 = dma.vmem_to_smem %s12_s20, 16, %s244_s24, [#allocation4] }
   0x3   :  { %19 = dma.vmem_to_smem %s17_s23, 16, %s245_s25, [#allocation4] }
   0x4   :  { %236 = dma.done.wait [#allocation4], 32 }
   0x5   :  { %237 = vsyncadd [#allocation4], 4294967264 }
   0x6   :  { %22 = sfence }
   0x7   :  { %23 = vsyncpa [#allocation8], 0  ;;  %s28_s28 = sshll.u32 %s329_s2, 4  ;;  %s246_s0 = smov [#allocation7]   ;;  %s29_s28 = int_to_ptr.hbm [resolvable:$true] %s28_s28 }
   0x8   :  { %s30_s29 = sshll.u32 %s246_s0, 4  ;;  %s247_s30 = smov 128   ;;  %s31_s29 = int_to_ptr.vmem [resolvable:$true] %s30_s29 }
   0x9   :  { %s248_s1 = smov 8  }
   0xa   :  { %36 = dma.hbm_to_vmem [thread:$0]  %s29_s28, 1024, %s31_s29, [#allocation8], %s247_s30, %s247_s30, %s248_s1  }
   0xb   :  { %238 = dma.done.wait [#allocation8], 1024  }
   0xc   :  { %239 = vsyncadd [#allocation8], 4294966272  ;;  %s290_s6 = smov 0  }
   0xd LB: > { %v58_v0 = vlaneseq  ;;  %s53_s2 = sld [smem:[#allocation5 + %s242_s6]]  ;;  %s162_s7 = sshll.u32 %s242_s6, 3  ;;  %v249_v4 = vmov 0.0   ;;  %vm66_vm1 = vcmask 261120   ;;  %vm104_vm2 = vcmask 0   ;;  %s242_s6 = sphi %s290_s6, %s50_s6  }
   0xe   : > { %s298_s8 = sld [smem:[#allocation6 + %s242_s6]]  ;;  %s56_s9 = scalar_lea.vmem [#allocation7], %s162_s7  ;;  %vm96_vm6 = vcmask 253952  }
   0xf   : > { %v59_v1 = vshrl.u32 %v58_v0, 7  ;;  %v57_v2 = vld [vmem:[%s56_s9] sm:$0xff]  ;;  %s103_s12 = scalar_lea.vmem [#allocation3], %s242_s6  ;;  %s95_s13 = scalar_lea.vmem [#allocation2], %s242_s6 }
  0x10   : > { %s50_s6 = sadd.s32 1, %s242_s6  }
  0x11   : > { %p47_p1 = scmp.ge.s32.totalorder %s50_s6, 8  }
  0x12   :  { %v110_v34 = vld [vmem:[%s330_s3 + $0x18] sm:$0xff] (%p47_p1)  ;;  %v109_v35 = vld [vmem:[%s330_s3 + $0x10] sm:$0xff] (%p47_p1)  ;;  %v250_v36 = vmov (%p47_p1), 0   ;;  %v108_v38 = vld [vmem:[%s330_s3 + $0x8] sm:$0xff] (%p47_p1)  ;;  %vm146_vm7 = vcmask (%p47_p1), 31744  }
  0x13   : > { %v60_v3 = vstv %s53_s2  ;;  %p98_p0 = scmp.lt.s32.totalorder %s53_s2, 8  ;;  %138 = vmatpush.msra.mxu0 (%p47_p1), %v110_v34  ;;  %182 = vset.pattern.permute.xlu0 (%p47_p1), %v250_v36  ;;  %v107_v39 = vld [vmem:[%s330_s3] sm:$0xff] (%p47_p1) }
  0x14   : > { %vm61_vm0 = vcmp.lt.s32.totalorder %v59_v1, %v60_v3  ;;  %v93_v31 = vstv %s298_s8  ;;  %v183_v41 = vld [vmem:[%s331_s4] ss:$0 sm:$0xff] (%p47_p1) }
  0x15   : > { %v163_v5 = vsel %vm61_vm0, 1.0, %v249_v4  ;;  %s335_s2 = smov (!%p98_p0, %s53_s2), 8  ;;  %139 = vmatpush.msra.mxu0 (%p47_p1), %v109_v35 }
  0x16   : > { %v64_v6 = vmul.f32 %v163_v5, %v57_v2  ;;  %s100_s10 = scvt.s32.f32 %s335_s2 }
  0x17   :  { %140 = vmatpush.msra.mxu0 (%p47_p1), %v108_v38 }
  0x18   : > { %v65_v7 = vmul.f32 %v64_v6, %v64_v6  ;;  %s101_s11 = smul.f32 %s100_s10, %s298_s8  ;;  %v74_v13 = vsel %vm66_vm1, %v64_v6, 0.0 }
  0x19   : > { %v75_v16 = vrot.slane %v74_v13, 4  ;;  %141 = vmatpush.msra.mxu0 (%p47_p1), %v107_v39 }
  0x1a   : > { %v67_v8 = vsel %vm66_vm1, %v65_v7, 0.0  ;;  %v102_v11 = vstv %s101_s11 }
  0x1b   : > { %v68_v9 = vrot.slane %v67_v8, 4  ;;  %105 = vst.msk [vmem:[%s103_s12] sm:$0x1] %vm104_vm2, %v102_v11  ;;  %v76_v18 = vadd.f32 %v75_v16, %v74_v13 }
  0x1d   : > { %v69_v10 = vadd.f32 %v68_v9, %v67_v8  ;;  %v77_v20 = vrot.slane %v76_v18, 2 }
  0x1f   : > { %v70_v12 = vrot.slane %v69_v10, 2  ;;  %v78_v22 = vadd.f32 %v77_v20, %v76_v18 }
  0x21   : > { %v71_v14 = vadd.f32 %v70_v12, %v69_v10  ;;  %v79_v25 = vrot.slane %v78_v22, 1 }
  0x22   :  { %v111_v37 = vld [vmem:[#allocation3] sm:$0xff] (%p47_p1) }
  0x23   : > { %v72_v15 = vrot.slane %v71_v14, 1  ;;  %v80_v28 = vadd.f32 %v79_v25, %v78_v22  ;;  %115 = vperm.xlu0 (%p47_p1), %182, %v111_v37  }
  0x25   : > { %v73_v17 = vadd.f32 %v72_v15, %v71_v14 }
  0x27   : > { %v81_v19 = vmax.f32 %v73_v17, 1e-24 }
  0x29   : > { %180 = vrsqrt.f32 %v81_v19  ;;  %vm88_vm3 = vweird.f32 %v81_v19 }
  0x2f   : > { %v181_v21 = vpop.eup %180 }
  0x30   : > { %v83_v23 = vmul.f32 %v181_v21, %v81_v19  ;;  %vm89_vm4 = vweird.f32 %v181_v21 }
  0x31   : > { %vm90_vm5 = vmor %vm88_vm3, %vm89_vm4 }
  0x32   : > { %v84_v24 = vmul.f32 %v181_v21, %v83_v23 }
  0x34   : > { %v85_v26 = vmul.f32 0.5, %v84_v24 }
  0x36   : > { %v86_v27 = vsub.f32 1.5, %v85_v26 }
  0x38   : > { %v87_v29 = vmul.f32 %v181_v21, %v86_v27 }
  0x3a   : > { %v91_v30 = vsel %vm90_vm5, %v181_v21, %v87_v29 }
  0x3b   : > { %v92_v32 = vmul.f32 %v91_v30, %v80_v28  ;;  %49 = sbr.rel (!%p47_p1) target bundleno = 13 (0xd), region = 46 }
  0x3d   : > { %v94_v33 = vmul.f32 %v93_v31, %v92_v32 }
  0x3f   : > { %97 = vst.msk [vmem:[%s95_s13] sm:$0x1] %vm96_vm6, %v94_v33 }
  0x46   :  { %v106_v40 = vld [vmem:[#allocation2] sm:$0xff] }
  0x47   :  { %164 = vmatmul.msk.f32.vlgmr.msra.gmra.mxu0 %vm66_vm1, %v106_v40 }
  0x95   :  { %v116_v42 = vpop.permute.xlu0 %115 }
  0x96   :  { %v121_v43 = vmul.f32 %v183_v41, %v116_v42 }
  0xc4   :  { %v143_v44 = vpop.f32.mrf.mxu0 }
  0xc5   :  { %v144_v45 = vadd.f32 %v143_v44, %v121_v43 }
  0xc7   :  { %147 = vst.msk [vmem:[%s332_s5] sm:$0xff] %vm146_vm7, %v144_v45 }
  0xc8   :  { %152 = vsyncpa [#allocation8], 1 }

</bundles_post_ra>
